<compile_context>
chip_gen: v6e
topology: v6e:2x2x1
jax: 0.10.0
libtpu: 0.0.40
codegen_flags: <defaults>
</compile_context>

<pallas_src>
import functools

import jax
import jax.numpy as jnp
from jax import lax
from jax.experimental import pallas as pl
from jax.experimental.pallas import tpu as pltpu


def _round_up(x, m):
    return (x + m - 1) // m * m


# Scoped-VMEM budget: fits v7x's 64 MiB physical VMEM; v5e/v6e (128 MiB) can raise
# this together with bigger tiles when tuning per generation.
_VMEM_LIMIT = 64 * 1024 * 1024


def _pick_tile(total, cap):
    """Largest multiple of 128 that divides `total` and is <= cap (else `total`)."""
    if total <= cap:
        return total
    t = (cap // 128) * 128
    while t >= 128:
        if total % t == 0:
            return t
        t -= 128
    return total


def _pick_row_tile(n, cap=256):
    """Multiple-of-128 row tile <= cap minimizing padding (prefer larger tiles)."""
    best, best_pad = 128, _round_up(n, 128) - n
    for t in range(256, cap + 1, 128):
        pad = _round_up(n, t) - n
        if pad <= best_pad:
            best, best_pad = t, pad
    return best


# --------------------------------------------------------------------------- #
# 1) Generic tiled linear:  out = x @ w + b   (bf16 MXU operands, f32 accumulate)
# --------------------------------------------------------------------------- #
def _linear_kernel(x_ref, w_ref, b_ref, o_ref, acc_ref):
    @pl.when(pl.program_id(2) == 0)
    def _init():
        acc_ref[...] = jnp.zeros_like(acc_ref)

    acc_ref[...] += jnp.dot(
        x_ref[...].astype(jnp.bfloat16),
        w_ref[...].astype(jnp.bfloat16),
        preferred_element_type=jnp.float32,
    )

    @pl.when(pl.program_id(2) == pl.num_programs(2) - 1)
    def _finalize():
        o_ref[...] = (acc_ref[...] + b_ref[...].astype(jnp.float32)).astype(o_ref.dtype)


def linear(x, w, b, *, row_tile, out_dtype, col_cap=512, k_cap=512):
    N, K = x.shape
    Kw, M = w.shape
    assert K == Kw
    col_tile = _pick_tile(M, col_cap)   # bound weight-block VMEM (v7x 64 MiB budget)
    k_tile = _pick_tile(K, k_cap)
    grid = (N // row_tile, M // col_tile, K // k_tile)
    return pl.pallas_call(
        _linear_kernel,
        out_shape=jax.ShapeDtypeStruct((N, M), out_dtype),
        grid_spec=pltpu.PrefetchScalarGridSpec(
            num_scalar_prefetch=0,
            grid=grid,
            in_specs=[
                pl.BlockSpec((row_tile, k_tile), lambda i, j, k: (i, k)),
                pl.BlockSpec((k_tile, col_tile), lambda i, j, k: (k, j)),
                pl.BlockSpec((1, col_tile), lambda i, j, k: (0, j)),
            ],
            out_specs=pl.BlockSpec((row_tile, col_tile), lambda i, j, k: (i, j)),
            scratch_shapes=[pltpu.VMEM((row_tile, col_tile), jnp.float32)],
        ),
        compiler_params=pltpu.CompilerParams(
            dimension_semantics=("parallel", "parallel", "arbitrary"),
            vmem_limit_bytes=_VMEM_LIMIT),
    )(x, w, b)


# --------------------------------------------------------------------------- #
# 2) Varlen flash attention with fused RoPE, reading q/k/v from the (Np, 3C)
#    qkv buffer and writing (Np, C) directly (no head transposes in HBM).
# --------------------------------------------------------------------------- #
def _flash_kernel(lo_ref, hi_ref,                        # scalar-prefetch (SMEM)
                  q_ref, k_ref, v_ref,
                  cosq_ref, sinq_ref, cosk_ref, sink_ref,
                  segq_ref, segk_ref,
                  o_ref,
                  q_sc, m_sc, l_sc, acc_sc,
                  *, scale):
    qi = pl.program_id(1)
    ki = pl.program_id(2)

    D = q_ref.shape[-1]
    D2 = D // 2
    lane = lax.broadcasted_iota(jnp.int32, (1, D), 1)
    sign = jnp.where(lane < D2, -1.0, 1.0).astype(jnp.float32)

    def rope(t, cos, sin):
        # rotate_half(x) = concat(-x2, x1) == roll(x, D/2, lane axis) * sign  (XLU)
        return t * cos + pltpu.roll(t, shift=D2, axis=1) * sign * sin

    @pl.when(ki == 0)
    def _init():
        # q is block-resident across the kv axis: RoPE + scale once, cache in bf16.
        q = rope(q_ref[...].astype(jnp.float32), cosq_ref[...], sinq_ref[...]) * scale
        q_sc[...] = q.astype(jnp.bfloat16)
        m_sc[...] = jnp.full(m_sc.shape, -1e30, dtype=jnp.float32)
        l_sc[...] = jnp.zeros(l_sc.shape, dtype=jnp.float32)
        acc_sc[...] = jnp.zeros(acc_sc.shape, dtype=jnp.float32)

    # Block-diagonal pruning: only kv blocks [lo, hi] overlap this q tile's
    # sequences. Steps past that range are skipped; their index_map is clamped to
    # `hi`, so the pipeline does not issue new DMAs for them either.
    n_kv = hi_ref[qi] - lo_ref[qi] + 1

    @pl.when(ki < n_kv)
    def _step():
        k = rope(k_ref[...].astype(jnp.float32),
                 cosk_ref[...], sink_ref[...]).astype(jnp.bfloat16)
        v = v_ref[...]                                               # bf16
        s = lax.dot_general(q_sc[...], k, (((1,), (1,)), ((), ())),
                            preferred_element_type=jnp.float32)     # (tq, tk) f32

        mask = segq_ref[...] == segk_ref[...]                        # (tq, tk)
        s = jnp.where(mask, s, -1e30)
        m_new = jnp.maximum(m_sc[...], s.max(axis=-1, keepdims=True))
        alpha = jnp.exp(m_sc[...] - m_new)
        # '* mask' is load-bearing: keeps rows whose visited kv blocks are (so far)
        # fully masked (pad rows / neighbouring-sequence rows) at exact zero.
        p = jnp.exp(s - m_new) * mask
        l_sc[...] = alpha * l_sc[...] + p.sum(axis=-1, keepdims=True)
        acc_sc[...] = alpha * acc_sc[...] + jnp.dot(
            p.astype(jnp.bfloat16), v, preferred_element_type=jnp.float32)
        m_sc[...] = m_new

    @pl.when(ki == pl.num_programs(2) - 1)
    def _finalize():
        l = jnp.where(l_sc[...] == 0.0, 1.0, l_sc[...])              # pad-row guard
        o_ref[...] = (acc_sc[...] * pl.reciprocal(l, approx=True)).astype(o_ref.dtype)


def flash_varlen_attention(qkv, cos, sin, seg_q, seg_k, kv_lo, kv_hi, *,
                           num_heads, head_dim, scale, tile, max_kv_steps,
                           out_dtype):
    """qkv: (Np, 3C) bf16; cos/sin: (Np, D) f32; seg_q: (Np,1); seg_k: (1,Np)."""
    Np, C3 = qkv.shape
    C = C3 // 3
    H, D = num_heads, head_dim
    num_q_tiles = Np // tile

    def kv_block(ki, qi, lo_ref, hi_ref):
        return jnp.minimum(lo_ref[qi] + ki, hi_ref[qi])

    # qkv column-block offsets (units of D): q at h, k at H + h, v at 2H + h.
    q_spec = pl.BlockSpec((tile, D), lambda h, qi, ki, lo, hi: (qi, h))
    k_spec = pl.BlockSpec(
        (tile, D), lambda h, qi, ki, lo, hi: (kv_block(ki, qi, lo, hi), H + h))
    v_spec = pl.BlockSpec(
        (tile, D), lambda h, qi, ki, lo, hi: (kv_block(ki, qi, lo, hi), 2 * H + h))
    cq_spec = pl.BlockSpec((tile, D), lambda h, qi, ki, lo, hi: (qi, 0))
    ck_spec = pl.BlockSpec(
        (tile, D), lambda h, qi, ki, lo, hi: (kv_block(ki, qi, lo, hi), 0))
    sq_spec = pl.BlockSpec((tile, 1), lambda h, qi, ki, lo, hi: (qi, 0))
    sk_spec = pl.BlockSpec(
        (1, tile), lambda h, qi, ki, lo, hi: (0, kv_block(ki, qi, lo, hi)))
    out_spec = pl.BlockSpec((tile, D), lambda h, qi, ki, lo, hi: (qi, h))

    kernel = functools.partial(_flash_kernel, scale=scale)
    return pl.pallas_call(
        kernel,
        out_shape=jax.ShapeDtypeStruct((Np, C), out_dtype),
        grid_spec=pltpu.PrefetchScalarGridSpec(
            num_scalar_prefetch=2,
            grid=(H, num_q_tiles, max_kv_steps),
            in_specs=[q_spec, k_spec, v_spec,
                      cq_spec, cq_spec, ck_spec, ck_spec,
                      sq_spec, sk_spec],
            out_specs=out_spec,
            scratch_shapes=[
                pltpu.VMEM((tile, D), jnp.bfloat16),   # cached RoPE'd, scaled q
                pltpu.VMEM((tile, 1), jnp.float32),    # running max
                pltpu.VMEM((tile, 1), jnp.float32),    # running sum
                pltpu.VMEM((tile, D), jnp.float32),    # output accumulator
            ],
        ),
        compiler_params=pltpu.CompilerParams(
            dimension_semantics=("parallel", "parallel", "arbitrary"),
            vmem_limit_bytes=_VMEM_LIMIT),
    )(kv_lo, kv_hi, qkv, qkv, qkv, cos, sin, cos, sin, seg_q, seg_k)


# --------------------------------------------------------------------------- #
# Full forward pass
# --------------------------------------------------------------------------- #
def attention_forward(x, cu_seqlens, freqs_cos, freqs_sin, params, num_heads,
                      *, tile_cap=256):
    """x: (N, C) flattened tokens; cu_seqlens: (S+1,); freqs_*: (N, head_dim)."""
    N, C = x.shape
    assert C % num_heads == 0
    D = C // num_heads
    assert D % 128 == 0, "column-sliced qkv layout requires head_dim % 128 == 0"
    scale = float(D) ** -0.5

    # Row/flash tile: multiple of 128 (lane-dense, bf16-safe), capped at 256 which
    # fits the v7x 64 MiB VMEM budget; v6e can raise tile_cap (e.g. 512).
    tile = _pick_row_tile(N, tile_cap)
    Np = _round_up(N, tile)
    pad = Np - N

    x_p = jnp.pad(x, ((0, pad), (0, 0))) if pad else x
    cos_p = jnp.pad(freqs_cos, ((0, pad), (0, 0))) if pad else freqs_cos
    sin_p = jnp.pad(freqs_sin, ((0, pad), (0, 0))) if pad else freqs_sin

    # segment id per token from cu_seqlens; pad q/k rows get non-matching ids.
    seg = jnp.searchsorted(cu_seqlens[1:],
                           jnp.arange(N, dtype=cu_seqlens.dtype),
                           side="right").astype(jnp.int32)
    seg_q = jnp.pad(seg, (0, pad), constant_values=-1).reshape(Np, 1)
    seg_k = jnp.pad(seg, (0, pad), constant_values=-2).reshape(1, Np)

    # Per-q-tile kv block range (block-diagonal mask => only these blocks overlap).
    num_q_tiles = Np // tile
    q_first = jnp.arange(num_q_tiles, dtype=jnp.int32) * tile       # always < N
    q_last = jnp.minimum(q_first + tile, N) - 1
    kv_lo = (cu_seqlens[seg[q_first]] // tile).astype(jnp.int32)
    kv_hi = ((cu_seqlens[seg[q_last] + 1] - 1) // tile).astype(jnp.int32)

    # Static kv-step count (host value, mirroring the module's max_seqlen=...item()
    # host sync); falls back to the dense extent if cu_seqlens is traced.
    try:
        max_kv_steps = int(jnp.max(kv_hi - kv_lo)) + 1
    except jax.errors.ConcretizationTypeError:
        max_kv_steps = Np // tile

    # 1) fused QKV matmul (bf16 MXU, f32 accumulate; bf16 activations between kernels)
    qkv = linear(x_p, params["w_qkv"], params["b_qkv"],
                 row_tile=tile, out_dtype=jnp.bfloat16)              # (Np, 3C)

    # 2) RoPE + block-diagonal (varlen) flash attention, q/k/v read straight out of
    #    the qkv buffer and the result written in (Np, C) layout (no transposes).
    attn = flash_varlen_attention(
        qkv, cos_p, sin_p, seg_q, seg_k, kv_lo, kv_hi,
        num_heads=num_heads, head_dim=D, scale=scale, tile=tile,
        max_kv_steps=max_kv_steps, out_dtype=jnp.bfloat16)           # (Np, C)

    # 3) output projection back to the input dtype
    out = linear(attn, params["w_proj"], params["b_proj"],
                 row_tile=tile, out_dtype=x.dtype)
    return out[:N]


# --------------------------------------------------------------------------- #
# Params + pure-JAX reference
# --------------------------------------------------------------------------- #
def make_params(key, dim, dtype=jnp.float32):
    k1, k2, k3 = jax.random.split(key, 3)
    w_qkv_t = jax.random.normal(k1, (3 * dim, dim), dtype) * 0.02    # torch (out,in)
    w_proj_t = jax.random.normal(k2, (dim, dim), dtype) * 0.02
    b_proj = jax.random.normal(k3, (dim,), dtype) * 0.02
    return {
        # Weights stored bf16 (MXU-native); biases kept f32 and added post-accumulate.
        "w_qkv": w_qkv_t.T.astype(jnp.bfloat16),                     # (C, 3C)
        "b_qkv": jnp.zeros((1, 3 * dim), jnp.float32),               # qkv_bias=False
        "w_proj": w_proj_t.T.astype(jnp.bfloat16),                   # (C, C)
        "b_proj": b_proj.reshape(1, -1).astype(jnp.float32),         # (1, C)
    }


def attention_reference(x, cu_seqlens, cos, sin, params, num_heads):
    N, C = x.shape
    D = C // num_heads
    w_qkv = params["w_qkv"].astype(jnp.float32)
    w_proj = params["w_proj"].astype(jnp.float32)
    qkv = (x @ w_qkv).reshape(N, 3, num_heads, D)
    q, k, v = qkv[:, 0], qkv[:, 1], qkv[:, 2]                        # (N, H, D)

    def rot_half(t):
        t1, t2 = t[..., :D // 2], t[..., D // 2:]
        return jnp.concatenate([-t2, t1], axis=-1)

    q = q * cos[:, None, :] + rot_half(q) * sin[:, None, :]
    k = k * cos[:, None, :] + rot_half(k) * sin[:, None, :]

    seg = jnp.searchsorted(cu_seqlens[1:],
                           jnp.arange(N, dtype=cu_seqlens.dtype), side="right")
    s = jnp.einsum('nhd,mhd->hnm', q, k) * (float(D) ** -0.5)
    mask = seg[:, None] == seg[None, :]
    s = jnp.where(mask[None], s, -jnp.inf)
    p = jax.nn.softmax(s, axis=-1)
    o = jnp.transpose(jnp.einsum('hnm,mhd->hnd', p, v), (1, 0, 2)).reshape(N, C)
    return o @ w_proj + params["b_proj"]


if __name__ == "__main__":
    # Small but layout-realistic: 2 sequences (varlen), 2 heads, head_dim=128.
    # N=370 pads to 384 = 3 x 128-row tiles -> exercises kv-block pruning, the
    # skipped-step path, pad rows, and multiple parallel grid steps per axis.
    num_heads = 2
    head_dim = 128
    dim = num_heads * head_dim            # 256
    seq_lens = [250, 120]
    N = sum(seq_lens)                     # 370 tokens
    dtype = jnp.float32

    key = jax.random.PRNGKey(0)
    kx, kp = jax.random.split(key, 2)
    x = jax.random.normal(kx, (N, dim), dtype)

    cu_seqlens = jnp.concatenate(
        [jnp.zeros((1,), jnp.int32),
         jnp.cumsum(jnp.array(seq_lens, dtype=jnp.int32))]).astype(jnp.int32)

    # rotary tables (position within each sequence), rotate_half convention
    pos = jnp.concatenate([jnp.arange(l, dtype=jnp.float32) for l in seq_lens])
    inv_freq = 1.0 / (10000.0 ** (jnp.arange(0, head_dim, 2, dtype=jnp.float32) / head_dim))
    ang = pos[:, None] * inv_freq[None, :]                           # (N, D/2)
    freqs_cos = jnp.concatenate([jnp.cos(ang), jnp.cos(ang)], axis=-1)  # (N, D)
    freqs_sin = jnp.concatenate([jnp.sin(ang), jnp.sin(ang)], axis=-1)  # (N, D)

    params = make_params(kp, dim, dtype)

    out = attention_forward(x, cu_seqlens, freqs_cos, freqs_sin, params, num_heads)
    out = jax.block_until_ready(out)

    ref = attention_reference(x, cu_seqlens, freqs_cos, freqs_sin, params, num_heads)
    assert out.shape == (N, dim)
    # bf16 MXU operands + approx reciprocal => coarser tolerance than pure f32.
    assert jnp.allclose(out, ref, atol=1e-2, rtol=1e-2), \
        float(jnp.max(jnp.abs(out - ref)))

    print("KERNEL_OK")
</pallas_src>

<mosaic_0001>
module attributes {stable_mosaic.version = 11 : i64} {
  func.func @_linear_kernel(%arg0: i32, %arg1: i32, %arg2: i32, %arg3: memref<128x256xf32, #tpu.memory_space<vmem>>, %arg4: memref<256x384xbf16, #tpu.memory_space<vmem>>, %arg5: memref<1x384xf32, #tpu.memory_space<vmem>>, %arg6: memref<128x384xbf16, #tpu.memory_space<vmem>>, %arg7: memref<128x384xf32, #tpu.memory_space<vmem>>) attributes {dimension_semantics = [#tpu.dimension_semantics<parallel>, #tpu.dimension_semantics<parallel>, #tpu.dimension_semantics<arbitrary>], iteration_bounds = array<i64: 3, 2, 1>, scalar_prefetch = 0 : i64, scratch_operands = 1 : i64, tpu.core_type = #tpu.core_type<tc>, window_params = [{transform_indices = @transform_0, window_bounds = array<i64: 128, 256>}, {transform_indices = @transform_1, window_bounds = array<i64: 256, 384>}, {transform_indices = @transform_2, window_bounds = array<i64: 1, 384>}, {transform_indices = @transform_3, window_bounds = array<i64: 128, 384>}]} {
    %c0_i32 = arith.constant 0 : i32
    %0 = arith.cmpi eq, %arg2, %c0_i32 : i32
    %1 = arith.extui %0 : i1 to i32
    %c0_i32_0 = arith.constant 0 : i32
    %2 = arith.cmpi ne, %1, %c0_i32_0 : i32
    scf.if %2 {
      %cst_10 = arith.constant 0.000000e+00 : f32
      %13 = vector.broadcast %cst_10 : f32 to vector<128x384xf32>
      %c0_11 = arith.constant 0 : index
      %c0_12 = arith.constant 0 : index
      %14 = vector.load %arg7[%c0_11, %c0_12] : memref<128x384xf32, #tpu.memory_space<vmem>>, vector<128x384xf32>
      tpu.vector_store %arg7[%c0_11, %c0_12], %13 {strides = array<i32>} : memref<128x384xf32, #tpu.memory_space<vmem>>, vector<128x384xf32>,
    } else {
    }
    %c0 = arith.constant 0 : index
    %c0_1 = arith.constant 0 : index
    %3 = vector.load %arg7[%c0, %c0_1] : memref<128x384xf32, #tpu.memory_space<vmem>>, vector<128x384xf32>
    %c0_2 = arith.constant 0 : index
    %c0_3 = arith.constant 0 : index
    %4 = vector.load %arg3[%c0_2, %c0_3] : memref<128x256xf32, #tpu.memory_space<vmem>>, vector<128x256xf32>
    %5 = arith.truncf %4 : vector<128x256xf32> to vector<128x256xbf16>
    %c0_4 = arith.constant 0 : index
    %c0_5 = arith.constant 0 : index
    %6 = vector.load %arg4[%c0_4, %c0_5] : memref<256x384xbf16, #tpu.memory_space<vmem>>, vector<256x384xbf16>
    %cst = arith.constant dense<0.000000e+00> : vector<128x384xf32>
    %7 = tpu.matmul %5, %6, %cst {dimension_numbers = #tpu.dot_dimension_numbers<[1], [0], [0], [1], [0, 0, 1, 1], [], []>} : vector<128x256xbf16>, vector<256x384xbf16>, vector<128x384xf32> -> vector<128x384xf32>
    %8 = arith.addf %3, %7 : vector<128x384xf32>
    %c0_6 = arith.constant 0 : index
    %c0_7 = arith.constant 0 : index
    %9 = vector.load %arg7[%c0_6, %c0_7] : memref<128x384xf32, #tpu.memory_space<vmem>>, vector<128x384xf32>
    tpu.vector_store %arg7[%c0_6, %c0_7], %8 {strides = array<i32>} : memref<128x384xf32, #tpu.memory_space<vmem>>, vector<128x384xf32>,
    %c0_i32_8 = arith.constant 0 : i32
    %10 = arith.cmpi eq, %arg2, %c0_i32_8 : i32
    %11 = arith.extui %10 : i1 to i32
    %c0_i32_9 = arith.constant 0 : i32
    %12 = arith.cmpi ne, %11, %c0_i32_9 : i32
    scf.if %12 {
      %c0_10 = arith.constant 0 : index
      %c0_11 = arith.constant 0 : index
      %13 = vector.load %arg7[%c0_10, %c0_11] : memref<128x384xf32, #tpu.memory_space<vmem>>, vector<128x384xf32>
      %c0_12 = arith.constant 0 : index
      %c0_13 = arith.constant 0 : index
      %14 = vector.load %arg5[%c0_12, %c0_13] : memref<1x384xf32, #tpu.memory_space<vmem>>, vector<1x384xf32>
      %15 = vector.broadcast %14 : vector<1x384xf32> to vector<128x384xf32>
      %16 = arith.addf %13, %15 : vector<128x384xf32>
      %17 = arith.truncf %16 : vector<128x384xf32> to vector<128x384xbf16>
      %c0_14 = arith.constant 0 : index
      %c0_15 = arith.constant 0 : index
      %18 = vector.load %arg6[%c0_14, %c0_15] : memref<128x384xbf16, #tpu.memory_space<vmem>>, vector<128x384xbf16>
      tpu.vector_store %arg6[%c0_14, %c0_15], %17 {strides = array<i32>} : memref<128x384xbf16, #tpu.memory_space<vmem>>, vector<128x384xbf16>,
    } else {
    }
    return
  }
  func.func @transform_0(%arg0: i32, %arg1: i32, %arg2: i32) -> (i32, i32) {
    %c0_i32 = arith.constant 0 : i32
    return %arg0, %arg2 : i32, i32
  }
  func.func @transform_1(%arg0: i32, %arg1: i32, %arg2: i32) -> (i32, i32) {
    %c0_i32 = arith.constant 0 : i32
    return %arg2, %arg1 : i32, i32
  }
  func.func @transform_2(%arg0: i32, %arg1: i32, %arg2: i32) -> (i32, i32) {
    %c0_i32 = arith.constant 0 : i32
    %c0_i32_0 = arith.constant 0 : i32
    return %c0_i32, %arg1 : i32, i32
  }
  func.func @transform_3(%arg0: i32, %arg1: i32, %arg2: i32) -> (i32, i32) {
    %c0_i32 = arith.constant 0 : i32
    return %arg0, %arg1 : i32, i32
  }
}

</mosaic_0001>

<bundles_post_ra>
// kernel: tpu_custom_call.1
= control target key start
LH: loop header
LB: loop body
LE: loop exit
PB: predicated region body
PF: predicated region fallthrough
CT: control target
= control target key end

     0   :  { %s2702_s0 = inlined_call_operand.hbm [shape: f32[384,256], index: 0, kind: input, shape index: {}]   ;;  %s2703_s1 = inlined_call_operand.hbm [shape: bf16[256,768], index: 1, kind: input, shape index: {}]   ;;  %s2704_s2 = inlined_call_operand.hbm [shape: f32[1,768], index: 2, kind: input, shape index: {}]   ;;  %s2705_s3 = inlined_call_operand.hbm [shape: bf16[384,768], index: 3, kind: output, shape index: {}]  }
   0x1   :  { %2716 = sst [smem:[#allocation25_spill]] %s2702_s0 }
   0x2   :  { %2717 = sst [smem:[#allocation26_spill]] %s2703_s1 }
   0x3   :  { %2718 = sst [smem:[#allocation27_spill]] %s2705_s3 }
   0x4   :  { %8 = vsyncpa [#allocation4], 0 }
   0x5   :  { %10 = vsyncpa [#allocation4 + $0x1], 0 }
   0x6   :  { %11 = vsyncpa [#allocation7], 0 }
   0x7   :  { %13 = vsyncpa [#allocation7 + $0x1], 0 }
   0x8   :  { %14 = vsyncpa [#allocation5], 0 }
   0x9   :  { %16 = vsyncpa [#allocation5 + $0x1], 0  ;;  %s2218_s12 = smov 0   ;;  %s2220_s13 = smov 0  }
   0xa   :  { %s2222_s14 = smov 0   ;;  %s2224_s15 = smov 0  }
   0xb   :  { %s2226_s16 = smov 0   ;;  %s2228_s17 = smov 0  }
   0xc   :  { %s2230_s18 = smov 0   ;;  %s2232_s19 = smov 0  }
   0xd   :  { %s2234_s20 = smov 0   ;;  %s2236_s21 = smov 0  }
   0xe   :  { %s2238_s22 = smov 0   ;;  %s2240_s23 = smov 0  }
   0xf   :  { %s2242_s24 = smov 0   ;;  %s2244_s25 = smov 0  }
  0x10 LB: > { %2719 = sst [smem:[#allocation13_spill]] %s2132_s12  ;;  %p58_p0 = scmp.eq.s32.totalorder %s2184_s25, 0  ;;  %s2184_s25 = sphi %s2244_s25, %s22_s25   ;;  %s2180_s24 = sphi %s2242_s24, %s2760_s24   ;;  %s2176_s23 = sphi %s2240_s23, %s2759_s23   ;;  %s2172_s22 = sphi %s2238_s22, %s2758_s22   ;;  %s2168_s21 = sphi %s2236_s21, %s2768_s21   ;;  %s2164_s20 = sphi %s2234_s20, %s2756_s20   ;;  %s2160_s19 = sphi %s2232_s19, %s2767_s19   ;;  %s2156_s18 = sphi %s2230_s18, %s2766_s18   ;;  %s2152_s17 = sphi %s2228_s17, %s2765_s17   ;;  %s2148_s16 = sphi %s2226_s16, %s2764_s16   ;;  %s2144_s15 = sphi %s2224_s15, %s2763_s15   ;;  %s2140_s14 = sphi %s2222_s14, %s2753_s14   ;;  %s2136_s13 = sphi %s2220_s13, %s2762_s13   ;;  %s2132_s12 = sphi %s2218_s12, %s2761_s12  }
  0x11   : > { %2720 = sst [smem:[#allocation14_spill]] %s2140_s14  ;;  %p85_p1 = scmp.ne.s32.totalorder %s2152_s17, %s2148_s16 }
  0x12   : > { %2721 = sst [smem:[#allocation15_spill]] %s2164_s20  ;;  %p91_p2 = scmp.ne.s32.totalorder %s2148_s16, %s2144_s15 }
  0x13   : > { %2722 = sst [smem:[#allocation16_spill]] %s2168_s21  ;;  %p87_p3 = por %p85_p1, %p58_p0 }
  0x14   : > { %2723 = sst [smem:[#allocation17_spill]] %s2172_s22  ;;  %p1766_p4 = scmp.lt.s32.totalorder %s2184_s25, 6 }
  0x15   : > { %2724 = sst [smem:[#allocation18_spill]] %s2176_s23  ;;  %s193_s28 = sand.u32 1, %s2184_s25  }
  0x16   : > { %2725 = sst [smem:[#allocation19_spill]] %s2180_s24  ;;  %s2706_s29 = sand.u32 1, %s2152_s17  }
  0x17   : > { %s1738_s30 = smul.u32 384, %s2706_s29  ;;  %p2305_p5 = pnand %p1766_p4, %p87_p3 }
  0x18   : > { %s1640_s4 = smul.u32 192, %s2176_s23  ;;  %s2727_s1 = sld [smem:[#allocation26_spill]] }
  0x19   : > { %s197_s9 = scalar_lea.vmem [#allocation6], %s1738_s30  ;;  %s2312_s11 = scalar_lea.sflag [#allocation7], %s193_s28 }
  0x1a   : > { %s207_s10 = sshll.u32 %s197_s9, 4  ;;  %p2710_p6 = pneg %p2305_p5  ;;  %s208_s10 = int_to_ptr.vmem [resolvable:$true] %s207_s10 }
  0x1b   : > { %s1965_s29 = scalar_lea.vmem %s208_s10, 6144  ;;  %s2186_s27 = smov [#allocation6]  }
  0x1c   : > { %p1966_p7 = scmp.ne.s32.totalorder %s208_s10, %s1965_s29  ;;  %s1970_s26 = sshll.u32 %s2186_s27, 4  ;;  %s1971_s26 = int_to_ptr.vmem [resolvable:$false] %s1970_s26 }
  0x1d   : > { %s1972_s6 = scalar_lea.vmem %s1971_s26, 12288  ;;  %p1973_p10 = scmp.lt.s32.totalorder %s208_s10, %s1971_s26 }
  0x1e   : > { %s206_s8 = scalar_lea.hbm %s2727_s1, %s1640_s4  ;;  %p1968_p8 = pnand %p1966_p7, %p2710_p6 }
  0x1f   : > { %p1974_p11 = scmp.lt.s32.totalorder %s1972_s6, %s1965_s29 }
  0x20   : > { %p1969_p9 = pneg %p1968_p8 }
  0x21   : > { %p1975_p12 = por %p1974_p11, %p1973_p10 }
  0x23   : > { %p1976_p13 = pnand %p1975_p12, %p1969_p9 }
  0x25   : > { %1979 = shalt.err (!%p1976_p13)
}
  0x26   : > { %s2187_s30 = smov 384   ;;  %s2188_s26 = smov 192  }
  0x27   : > { %s2189_s27 = smov 12   ;;  %p1551_p1 = scmp.ge.s32.totalorder %s2184_s25, 1 }
  0x28   : > { %1758 = dma.hbm_to_vmem [thread:$0]  (!%p2305_p5), %s206_s8, 6144, %s208_s10, %s2312_s11, %s2187_s30, %s2188_s26, %s2189_s27  }
  0x29   : > { %p234_p3 = scmp.lt.s32.totalorder %s2184_s25, 7  ;;  %s2329_s29 = sadd.s32 4294967295, %s2184_s25  }
  0x2a   : > { %s1542_s4 = sadd.s32 4294967294, %s2184_s25   ;;  %s2729_s7 = sadd.s32 1, %s2176_s23 }
  0x2b   : > { %p2324_p7 = pnand %p1551_p1, %p234_p3  ;;  %p39_p8 = scmp.ge.s32.totalorder %s2729_s7, 2 }
  0x2c   : > { %s41_s9 = sadd.s32 1, %s2180_s24  ;;  %s50_s6 = sadd.s32 1, %s2164_s20 }
  0x2d   : > { %s2730_s1 = smov %s2729_s7  ;;  %s2772_s9 = smov (!%p39_p8, %s41_s9), %s2180_s24 }
  0x2e   : > { %s2770_s1 = smov (%p39_p8, %s2730_s1), 0  ;;  %p57_p9 = scmp.ne.s32.totalorder %s2164_s20, %s2160_s19 }
  0x2f   : > { %2731 = sst [smem:[#allocation20_spill]] %s2770_s1  ;;  %p63_p10 = scmp.ne.s32.totalorder %s2160_s19, %s2156_s18 }
  0x30   : > { %p43_p11 = scmp.ge.s32.totalorder %s2772_s9, 3  ;;  %p64_p12 = scmp.eq.s32.totalorder %s2329_s29, 0 }
  0x31   : > { %p2348_p13 = por %p58_p0, %p57_p9  ;;  %s74_s10 = ssub.s32 %s2176_s23, %s2770_s1 }
  0x32   : > { %s2774_s9 = smov (%p43_p11, %s2772_s9), 0  ;;  %p2356_p1 = por %p64_p12, %p63_p10 }
  0x33   : > { %2733 = sst [smem:[#allocation21_spill]] %s2774_s9  ;;  %p76_p3 = scmp.eq.s32.totalorder %s74_s10, 0 }
  0x34   : > { %s45_s18 = ssub.s32 %s2180_s24, %s2774_s9  ;;  %p2365_p8 = por %p91_p2, %p64_p12 }
  0x35   : > { %p48_p0 = scmp.eq.s32.totalorder %s45_s18, 0  ;;  %s129_s27 = sor.u32 %s74_s10, %s45_s18 }
  0x36   : > { %s2736_s7 = sadd.s32 1, %s2152_s17  ;;  %p130_p9 = scmp.eq.s32.totalorder %s129_s27, 0 }
  0x37   : > { %s2372_s1 = scalar_select %p76_p3, %s2152_s17, %s2736_s7  }
  0x38   : > { %s2375_s3 = scalar_select %p48_p0, %s2164_s20, %s50_s6  }
  0x39   : > { %2737 = sst [smem:[#allocation22_spill]] %s2372_s1  ;;  %s132_s22 = sadd.s32 1, %s2140_s14 }
  0x3a   : > { %2738 = sst [smem:[#allocation23_spill]] %s2375_s3  ;;  %p142_p10 = scmp.ne.s32.totalorder %s2140_s14, %s2136_s13 }
  0x3b   : > { %p143_p11 = scmp.eq.s32.totalorder %s2329_s29, 5  ;;  %p148_p12 = scmp.ne.s32.totalorder %s2136_s13, %s2132_s12 }
  0x3c   : > { %s2382_s15 = scalar_select %p130_p9, %s2140_s14, %s132_s22  }
  0x3d   : > { %p2384_p2 = por %p143_p11, %p142_p10  ;;  %p149_p6 = scmp.eq.s32.totalorder %s1542_s4, 5 }
  0x3e   : > { %2739 = sst [smem:[#allocation24_spill]] %s2382_s15  ;;  %s169_s10 = sand.u32 1, %s2164_s20  }
  0x3f   : > { %s1545_s18 = sshll.u32 %s169_s10, 8  ;;  %p2391_p3 = por %p149_p6, %p148_p12 }
  0x40   : > { %s1639_s27 = sshll.u32 %s2180_s24, 12  ;;  %s173_s7 = scalar_lea.vmem [#allocation3], %s1545_s18 }
  0x41   : > { %s2741_s6 = scalar_select %p2391_p3, 1, 0 }
  0x42   : > { %s183_s3 = sshll.u32 %s173_s7, 4  ;;  %s2742_s0 = sld [smem:[#allocation25_spill]]  ;;  %s184_s3 = int_to_ptr.vmem [resolvable:$true] %s183_s3 }
  0x43   : > { %p2403_p0 = pnand %p1766_p4, %p2348_p13  ;;  %s2744_s4 = sand.u32 1, %s2152_s17  }
  0x44   : > { %s1739_s20 = smul.u32 3, %s2744_s4  ;;  %s170_s12 = scalar_lea.sflag [#allocation4], %s169_s10 }
  0x45   : > { %s1641_s14 = smul.u32 48, %s2176_s23  ;;  %p1982_p6 = pneg %p2403_p0 }
  0x46   : > { %s1993_s18 = scalar_lea.vmem %s184_s3, 4096  ;;  %s2190_s1 = smov [#allocation3]  }
  0x47   : > { %p1994_p9 = scmp.ne.s32.totalorder %s184_s3, %s1993_s18  ;;  %s1998_s21 = sshll.u32 %s2190_s1, 4  ;;  %s1999_s21 = int_to_ptr.vmem [resolvable:$false] %s1998_s21 }
  0x48   : > { %s182_s22 = scalar_lea.hbm %s2742_s0, %s1639_s27  ;;  %s2000_s8 = scalar_lea.vmem %s1999_s21, 8192 }
  0x49   : > { %p1996_p10 = pnand %p1994_p9, %p1982_p6  ;;  %p2001_p12 = scmp.lt.s32.totalorder %s184_s3, %s1999_s21 }
  0x4a   : > { %p2002_p4 = scmp.lt.s32.totalorder %s2000_s8, %s1993_s18 }
  0x4b   : > { %p1997_p11 = pneg %p1996_p10 }
  0x4c   : > { %p2003_p13 = por %p2002_p4, %p2001_p12 }
  0x4e   : > { %p2004_p3 = pnand %p2003_p13, %p1997_p11 }
  0x50   : > { %2007 = shalt.err (!%p2004_p3)
}
  0x51   : > { %s2191_s27 = smov 256   ;;  %s2192_s7 = smov 16  }
  0x52   : > { %1755 = dma.hbm_to_vmem [thread:$0]  (!%p2403_p0), %s182_s22, 4096, %s184_s3, %s170_s12, %s2191_s27, %s2191_s27, %s2192_s7  }
  0x53   : > { %s227_s0 = scalar_lea.hbm %s2704_s2, %s1641_s14  ;;  %s221_s24 = scalar_lea.vmem [#allocation8], %s1739_s20 }
  0x54   : > { %s229_s23 = sshll.u32 %s221_s24, 4  ;;  %p2745_p9 = pneg %p2305_p5  ;;  %s230_s23 = int_to_ptr.vmem [resolvable:$true] %s229_s23 }
  0x55   : > { %s2021_s1 = scalar_lea.vmem %s230_s23, 48  ;;  %s2193_s18 = smov [#allocation8]  }
  0x56   : > { %p2022_p6 = scmp.ne.s32.totalorder %s230_s23, %s2021_s1  ;;  %s2026_s21 = sshll.u32 %s2193_s18, 4  ;;  %s2027_s21 = int_to_ptr.vmem [resolvable:$false] %s2026_s21 }
  0x57   : > { %s2028_s8 = scalar_lea.vmem %s2027_s21, 96  ;;  %p2029_p3 = scmp.lt.s32.totalorder %s230_s23, %s2027_s21 }
  0x58   : > { %p2024_p10 = pnand %p2022_p6, %p2745_p9  ;;  %p2030_p12 = scmp.lt.s32.totalorder %s2028_s8, %s2021_s1 }
  0x5a   : > { %p2025_p11 = pneg %p2024_p10  ;;  %p2031_p0 = por %p2030_p12, %p2029_p3 }
  0x5c   : > { %p2032_p4 = pnand %p2031_p0, %p2025_p11 }
  0x5e   : > { %2035 = shalt.err (!%p2032_p4)
}
  0x5f   : > { %1761 = dma.hbm_to_vmem [thread:$0]  (!%p2305_p5), %s227_s0, 48, %s230_s23, %s2312_s11  }
  0x60   : > { %238 = sbr.rel (%p2324_p7) target bundleno = 446 (0x1be), region = 32  ;;  %s240_s3 = sand.u32 (!%p2324_p7), 1, %s2160_s19  }
  0x61   : > { %s1552_s12 = sshll.u32 (!%p2324_p7), %s240_s3, 8  ;;  %s241_s14 = scalar_lea.sflag (!%p2324_p7), [#allocation4], %s240_s3 }
  0x62   : > { %s2426_s20 = scalar_lea.vmem (!%p2324_p7), [#allocation3], %s1552_s12 }
  0x65   : > { %2119 = dma.done.wait (%p2356_p1), %s241_s14, 4096  }
  0x66   : > { %2121 = vsyncadd (%p2356_p1), %s241_s14, 4294963200  ;;  %s249_s0 = sand.u32 1, %s2329_s29   ;;  %s251_s23 = sand.u32 1, %s2148_s16  }
  0x67   : > { %s1740_s24 = smul.u32 384, %s251_s23  ;;  %s250_s5 = scalar_lea.sflag [#allocation7], %s249_s0 }
  0x69   : > { %s2436_s11 = scalar_lea.vmem [#allocation6], %s1740_s24 }
  0x6a   : > { %2123 = dma.done.wait (%p2365_p8), %s250_s5, 6192  }
  0x6b   : > { %2125 = vsyncadd (%p2365_p8), %s250_s5, 4294961104  ;;  %v1888_v0 = vld [vmem:[%s2436_s11 + $0xac] ss:$12 sps:$4 sm:$0xff]   ;;  %v1890_v1 = vld [vmem:[%s2436_s11 + $0xa8] ss:$12 sps:$4 sm:$0xff]   ;;  %s1741_s28 = smul.u32 3, %s251_s23 }
  0x6c   : > { %771 = vmatprep.subr.bf16.mxu0 %v1888_v0  ;;  %v1891_v2 = vld [vmem:[%s2436_s11 + $0x94] ss:$12 sps:$4 sm:$0xff]   ;;  %v1893_v3 = vld [vmem:[%s2436_s11 + $0x90] ss:$12 sps:$4 sm:$0xff]   ;;  %v1896_v5 = vld [vmem:[%s2436_s11 + $0x78] ss:$12 sps:$4 sm:$0xff]  }
  0x6d   : > { %772 = vmatpush1.bf16.msra.mxu0 %v1890_v1  ;;  %v1894_v4 = vld [vmem:[%s2436_s11 + $0x7c] ss:$12 sps:$4 sm:$0xff]   ;;  %v1897_v6 = vld [vmem:[%s2436_s11 + $0x64] ss:$12 sps:$4 sm:$0xff]   ;;  %v1899_v8 = vld [vmem:[%s2436_s11 + $0x60] ss:$12 sps:$4 sm:$0xff]  }
  0x6e   : > { %773 = vmatprep.subr.bf16.mxu0 %v1891_v2  ;;  %v1908_v7 = vld [vmem:[%s2436_s11 + $0x170] ss:$12 sps:$4 sm:$0xff]   ;;  %v1900_v10 = vld [vmem:[%s2436_s11 + $0x4c] ss:$12 sps:$4 sm:$0xff]   ;;  %v1902_v13 = vld [vmem:[%s2436_s11 + $0x48] ss:$12 sps:$4 sm:$0xff]  }
  0x6f   : > { %1674 = vmatprep.subr.bf16.mxu1 %v1908_v7  ;;  %v1910_v9 = vld [vmem:[%s2436_s11 + $0xb0] ss:$12 sps:$4 sm:$0xff]   ;;  %v1913_v11 = vld [vmem:[%s2436_s11 + $0x158] ss:$12 sps:$4 sm:$0xff]   ;;  %v1903_v14 = vld [vmem:[%s2436_s11 + $0x34] ss:$12 sps:$4 sm:$0xff]  }
  0x70   : > { %1675 = vmatpush3.bf16.msra.mxu1 %v1910_v9  ;;  %v1915_v12 = vld [vmem:[%s2436_s11 + $0x98] ss:$12 sps:$4 sm:$0xff]   ;;  %v1918_v15 = vld [vmem:[%s2436_s11 + $0x140] ss:$12 sps:$4 sm:$0xff]   ;;  %v1905_v17 = vld [vmem:[%s2436_s11 + $0x30] ss:$12 sps:$4 sm:$0xff]  }
  0x71   : > { %774 = vmatpush1.bf16.msra.mxu0 %v1893_v3  ;;  %1676 = vmatprep.subr.bf16.mxu1 %v1913_v11  ;;  %v1920_v16 = vld [vmem:[%s2436_s11 + $0x80] ss:$12 sps:$4 sm:$0xff]   ;;  %v1923_v18 = vld [vmem:[%s2436_s11 + $0x128] ss:$12 sps:$4 sm:$0xff]   ;;  %v1909_v21 = vld [vmem:[%s2436_s11 + $0x18] ss:$12 sps:$4 sm:$0xff]  }
  0x72   : > { %775 = vmatprep.subr.bf16.mxu0 %v1894_v4  ;;  %v1906_v19 = vld [vmem:[%s2436_s11 + $0x1c] ss:$12 sps:$4 sm:$0xff]   ;;  %v1911_v23 = vld [vmem:[%s2436_s11 + $0x4] ss:$12 sps:$4 sm:$0xff]   ;;  %v1914_v26 = vld [vmem:[%s2436_s11] ss:$12 sps:$4 sm:$0xff]  }
  0x73   : > { %v1925_v20 = vld [vmem:[%s2436_s11 + $0x68] ss:$12 sps:$4 sm:$0xff]   ;;  %v1928_v22 = vld [vmem:[%s2436_s11 + $0x110] ss:$12 sps:$4 sm:$0xff]   ;;  %v1933_v25 = vld [vmem:[%s2436_s11 + $0xf8] ss:$12 sps:$4 sm:$0xff]  }
  0x74   : > { %1677 = vmatpush3.bf16.msra.mxu1 %v1915_v12  ;;  %v1930_v24 = vld [vmem:[%s2436_s11 + $0x50] ss:$12 sps:$4 sm:$0xff]   ;;  %v1916_v27 = vld [vmem:[%s2436_s11 + $0x16c] ss:$12 sps:$4 sm:$0xff]   ;;  %v1919_v30 = vld [vmem:[%s2436_s11 + $0x168] ss:$12 sps:$4 sm:$0xff]  }
  0x75   : > { %776 = vmatpush1.bf16.msra.mxu0 %v1896_v5  ;;  %1678 = vmatprep.subr.bf16.mxu1 %v1918_v15  ;;  %v1935_v28 = vld [vmem:[%s2436_s11 + $0x38] ss:$12 sps:$4 sm:$0xff]   ;;  %v1938_v29 = vld [vmem:[%s2436_s11 + $0xe0] ss:$12 sps:$4 sm:$0xff]   ;;  %v1924_v32 = vld [vmem:[%s2436_s11 + $0x150] ss:$12 sps:$4 sm:$0xff]  }
  0x76   : > { %777 = vmatprep.subr.bf16.mxu0 %v1897_v6  ;;  %v1921_v31 = vld [vmem:[%s2436_s11 + $0x154] ss:$12 sps:$4 sm:$0xff]   ;;  %v404_v35 = vld [vmem:[%s2426_s20 + $0x8] sm:$0xff]  ;;  %v406_v36 = vld [vmem:[%s2426_s20 + $0x18] sm:$0xff]  ;;  %s262_s29 = scalar_lea.vmem [#allocation8], %s1741_s28  ;;  %s292_s30 = sand.u32 1, %s2136_s13  }
  0x77   : > { %v1940_v33 = vld [vmem:[%s2436_s11 + $0x20] ss:$12 sps:$4 sm:$0xff]   ;;  %v1943_v34 = vld [vmem:[%s2436_s11 + $0xc8] ss:$12 sps:$4 sm:$0xff]   ;;  %v436_v39 = vpack.c.bf16 %v406_v36, %v404_v35  ;;  %v1929_v43 = vld [vmem:[%s2436_s11 + $0x138] ss:$12 sps:$4 sm:$0xff]  }
  0x78   : > { %1679 = vmatpush3.bf16.msra.mxu1 %v1920_v16  ;;  %v1926_v37 = vld [vmem:[%s2436_s11 + $0x13c] ss:$12 sps:$4 sm:$0xff]   ;;  %v403_v40 = vld [vmem:[%s2426_s20] sm:$0xff]  ;;  %v405_v41 = vld [vmem:[%s2426_s20 + $0x10] sm:$0xff]  ;;  %s1742_s26 = smul.u32 192, %s292_s30  ;;  %s2746_s22 = sld [smem:[#allocation16_spill]] }
  0x79   : > { %778 = vmatpush1.bf16.msra.mxu0 %v1899_v8  ;;  %1680 = vmatprep.subr.bf16.mxu1 %v1923_v18  ;;  %v1945_v38 = vld [vmem:[%s2436_s11 + $0x8] ss:$12 sps:$4 sm:$0xff]   ;;  %v410_v44 = vld [vmem:[%s2426_s20 + $0x38] sm:$0xff]  ;;  %v1931_v45 = vld [vmem:[%s2436_s11 + $0x124] ss:$12 sps:$4 sm:$0xff]   ;;  %v435_v46 = vpack.c.bf16 %v405_v41, %v403_v40  ;;  %s2747_s27 = sld [smem:[#allocation17_spill]] }
  0x7a   : > { %779 = vmatprep.subr.bf16.mxu0 %v1900_v10  ;;  %916 = vmatprep.mubr.bf16.mxu1 %v436_v39  ;;  %v408_v42 = vld [vmem:[%s2426_s20 + $0x28] sm:$0xff]  ;;  %v407_v50 = vld [vmem:[%s2426_s20 + $0x20] sm:$0xff]  ;;  %v409_v51 = vld [vmem:[%s2426_s20 + $0x30] sm:$0xff]  ;;  %s2530_s15 = scalar_lea.vmem [#allocation9], %s1742_s26  ;;  %s2748_s3 = sld [smem:[#allocation27_spill]] }
  0x7b   : > { %803 = vmatprep.mubr.bf16.mxu0 %v436_v39  ;;  %v438_v47 = vpack.c.bf16 %v410_v44, %v408_v42  ;;  %v1934_v48 = vld [vmem:[%s2436_s11 + $0x120] ss:$12 sps:$4 sm:$0xff]   ;;  %v414_v53 = vld [vmem:[%s2426_s20 + $0x58] sm:$0xff]  ;;  %v1939_v54 = vld [vmem:[%s2436_s11 + $0x108] ss:$12 sps:$4 sm:$0xff]   ;;  %v437_v56 = vpack.c.bf16 %v409_v51, %v407_v50  ;;  %s1402_s18 = sshll.u32 %s2530_s15, 4  ;;  %s2622_s18 = int_to_ptr.vmem [resolvable:$true] %s1402_s18 }
  0x7c   : > { %1681 = vmatpush3.bf16.msra.mxu1 %v1925_v20  ;;  %v1936_v49 = vld [vmem:[%s2436_s11 + $0x10c] ss:$12 sps:$4 sm:$0xff]   ;;  %v1941_v55 = vld [vmem:[%s2436_s11 + $0xf4] ss:$12 sps:$4 sm:$0xff]   ;;  %v1944_v58 = vld [vmem:[%s2436_s11 + $0xf0] ss:$12 sps:$4 sm:$0xff]  }
  0x7d   : > { %780 = vmatpush1.bf16.msra.mxu0 %v1902_v13  ;;  %1682 = vmatprep.subr.bf16.mxu1 %v1928_v22  ;;  %v412_v52 = vld [vmem:[%s2426_s20 + $0x48] sm:$0xff]  ;;  %v411_v60 = vld [vmem:[%s2426_s20 + $0x40] sm:$0xff]  ;;  %v413_v61 = vld [vmem:[%s2426_s20 + $0x50] sm:$0xff]  ;;  %s2627_s14 = scalar_lea.sflag [#allocation5], %s292_s30  ;;  %s2194_s0 = smov [#allocation9]  }
  0x7e   : > { %781 = vmatprep.subr.bf16.mxu0 %v1903_v14  ;;  %v440_v57 = vpack.c.bf16 %v414_v53, %v412_v52  ;;  %v1946_v59 = vld [vmem:[%s2436_s11 + $0xdc] ss:$12 sps:$4 sm:$0xff]   ;;  %v1948_v0 = vld [vmem:[%s2436_s11 + $0xd8] ss:$12 sps:$4 sm:$0xff]   ;;  %v439_v2 = vpack.c.bf16 %v413_v61, %v411_v60  ;;  %v1951_v4 = vld [vmem:[%s2436_s11 + $0xc0] ss:$12 sps:$4 sm:$0xff]  }
  0x7f   : > { %v416_v62 = vld [vmem:[%s2426_s20 + $0x68] sm:$0xff]  ;;  %v418_v63 = vld [vmem:[%s2426_s20 + $0x78] sm:$0xff]  ;;  %v1949_v1 = vld [vmem:[%s2436_s11 + $0xc4] ss:$12 sps:$4 sm:$0xff]   ;;  %s1394_s7 = smul.u32 3, %s2746_s22  ;;  %s2040_s23 = sshll.u32 %s2194_s0, 4  ;;  %s2041_s23 = int_to_ptr.vmem [resolvable:$false] %s2040_s23 }
  0x80   : > { %1683 = vmatpush3.bf16.msra.mxu1 %v1930_v24  ;;  %v442_v3 = vpack.c.bf16 %v418_v63, %v416_v62  ;;  %v415_v5 = vld [vmem:[%s2426_s20 + $0x60] sm:$0xff]  ;;  %v417_v6 = vld [vmem:[%s2426_s20 + $0x70] sm:$0xff]  ;;  %v420_v7 = vld [vmem:[%s2426_s20 + $0x88] sm:$0xff]  ;;  %s1743_s10 = smul.u32 96, %s2747_s27  ;;  %s2042_s24 = scalar_lea.vmem %s2041_s23, 6144 }
  0x81   : > { %782 = vmatpush1.bf16.msra.mxu0 %v1905_v17  ;;  %1684 = vmatprep.subr.bf16.mxu1 %v1933_v25  ;;  %v422_v8 = vld [vmem:[%s2426_s20 + $0x98] sm:$0xff]  ;;  %v441_v9 = vpack.c.bf16 %v417_v6, %v415_v5  ;;  %v419_v11 = vld [vmem:[%s2426_s20 + $0x80] sm:$0xff]  ;;  %v421_v12 = vld [vmem:[%s2426_s20 + $0x90] sm:$0xff]  ;;  %p2043_p8 = scmp.lt.s32.totalorder %s2622_s18, %s2041_s23 }
  0x82   : > { %783 = vmatprep.subr.bf16.mxu0 %v1906_v19  ;;  %v444_v10 = vpack.c.bf16 %v422_v8, %v420_v7  ;;  %v424_v13 = vld [vmem:[%s2426_s20 + $0xa8] sm:$0xff]  ;;  %v426_v14 = vld [vmem:[%s2426_s20 + $0xb8] sm:$0xff]  ;;  %v443_v15 = vpack.c.bf16 %v421_v12, %v419_v11  ;;  %v423_v17 = vld [vmem:[%s2426_s20 + $0xa0] sm:$0xff]  ;;  %s1399_s4 = sadd.s32 %s1743_s10, %s1394_s7 }
  0x83   : > { %v446_v16 = vpack.c.bf16 %v426_v14, %v424_v13  ;;  %v425_v18 = vld [vmem:[%s2426_s20 + $0xb0] sm:$0xff]  ;;  %v428_v19 = vld [vmem:[%s2426_s20 + $0xc8] sm:$0xff]  ;;  %v430_v20 = vld [vmem:[%s2426_s20 + $0xd8] sm:$0xff]  ;;  %s1635_s1 = sshll.u32 %s1399_s4, 6 }
  0x84   : > { %1685 = vmatpush3.bf16.msra.mxu1 %v1935_v28  ;;  %v448_v22 = vpack.c.bf16 %v430_v20, %v428_v19  ;;  %v429_v24 = vld [vmem:[%s2426_s20 + $0xd0] sm:$0xff]  ;;  %v432_v25 = vld [vmem:[%s2426_s20 + $0xe8] sm:$0xff]  ;;  %v1128_v35 = vld [vmem:[%s262_s29] sm:$0x7]  ;;  %s2620_s12 = scalar_lea.hbm %s2748_s3, %s1635_s1 }
  0x85   : > { %784 = vmatpush1.bf16.msra.mxu0 %v1909_v21  ;;  %1686 = vmatprep.subr.bf16.mxu1 %v1938_v29  ;;  %v445_v21 = vpack.c.bf16 %v425_v18, %v423_v17  ;;  %v431_v29 = vld [vmem:[%s2426_s20 + $0xe0] sm:$0xff] }
  0x86   : > { %785 = vmatprep.subr.bf16.mxu0 %v1911_v23  ;;  %v427_v23 = vld [vmem:[%s2426_s20 + $0xc0] sm:$0xff] }
  0x88   : > { %1687 = vmatpush3.bf16.msra.mxu1 %v1940_v33 }
  0x89   : > { %786 = vmatpush1.bf16.msra.mxu0 %v1914_v26  ;;  %1688 = vmatprep.subr.bf16.mxu1 %v1943_v34  ;;  %v434_v26 = vld [vmem:[%s2426_s20 + $0xf8] sm:$0xff] }
  0x8a   : > { %787 = vmatprep.subr.bf16.mxu0 %v1916_v27  ;;  %v447_v27 = vpack.c.bf16 %v429_v24, %v427_v23  ;;  %v450_v28 = vpack.c.bf16 %v434_v26, %v432_v25 }
  0x8c   : > { %1689 = vmatpush3.bf16.msra.mxu1 %v1945_v38 }
  0x8d   : > { %788 = vmatpush2.bf16.msra.mxu0 %v1919_v30  ;;  %v433_v30 = vld [vmem:[%s2426_s20 + $0xf0] sm:$0xff]  ;;  %s2036_s20 = scalar_lea.vmem %s2622_s18, 3072 }
  0x8e   : > { %789 = vmatprep.subr.bf16.mxu0 %v1921_v31  ;;  %v449_v31 = vpack.c.bf16 %v433_v30, %v431_v29  ;;  %p2037_p5 = scmp.ne.s32.totalorder %s2622_s18, %s2036_s20  ;;  %p2044_p13 = scmp.lt.s32.totalorder %s2042_s24, %s2036_s20 }
  0x8f   : > { %917 = vmatmul.mubr.bf16.vlgmr.msra.gmra.mxu1 %v435_v46 }
  0x90   : > { %924 = vmatprep.mubr.bf16.mxu1 %v438_v47  ;;  %p2038_p7 = pnand %p2037_p5, %p2384_p2  ;;  %p2045_p6 = por %p2044_p13, %p2043_p8 }
  0x91   : > { %790 = vmatpush2.bf16.msra.mxu0 %v1924_v32  ;;  %v1130_v32 = vlaneseq }
  0x92   : > { %791 = vmatprep.subr.bf16.mxu0 %v1926_v37  ;;  %p2039_p1 = pneg %p2038_p7 }
  0x93   : > { %v1131_v33 = vshrl.u32 %v1130_v32, 7 }
  0x94   : > { %p2046_p9 = pnand %p2045_p6, %p2039_p1 }
  0x95   : > { %792 = vmatpush2.bf16.msra.mxu0 %v1929_v43  ;;  %v1140_v34 = vsub.s32 2, %v1131_v33 }
  0x96   : > { %793 = vmatprep.subr.bf16.mxu0 %v1931_v45 }
  0x97   : > { %925 = vmatmul.mubr.bf16.gmra.mxu1 %v437_v56  ;;  %v2525_v37 = vrot.slane %v1128_v35, %v1140_v34 }
  0x98   : > { %932 = vmatprep.mubr.bf16.mxu1 %v440_v57 }
  0x99   : > { %794 = vmatpush2.bf16.msra.mxu0 %v1934_v48 }
  0x9a   : > { %795 = vmatprep.subr.bf16.mxu0 %v1936_v49 }
  0x9d   : > { %796 = vmatpush2.bf16.msra.mxu0 %v1939_v54 }
  0x9e   : > { %797 = vmatprep.subr.bf16.mxu0 %v1941_v55 }
  0x9f   : > { %933 = vmatmul.mubr.bf16.gmra.mxu1 %v439_v2 }
  0xa0   : > { %940 = vmatprep.mubr.bf16.mxu1 %v442_v3 }
  0xa1   : > { %798 = vmatpush2.bf16.msra.mxu0 %v1944_v58 }
  0xa2   : > { %799 = vmatprep.subr.bf16.mxu0 %v1946_v59 }
  0xa5   : > { %800 = vmatpush2.bf16.msra.mxu0 %v1948_v0 }
  0xa6   : > { %801 = vmatprep.subr.bf16.mxu0 %v1949_v1 }
  0xa7   : > { %941 = vmatmul.mubr.bf16.gmra.mxu1 %v441_v9 }
  0xa8   : > { %948 = vmatprep.mubr.bf16.mxu1 %v444_v10 }
  0xa9   : > { %802 = vmatpush2.bf16.msra.mxu0 %v1951_v4 }
  0xac   : > { %804 = vmatmul.mubr.bf16.vlgmr.msra.gmra.mxu0 %v435_v46 }
  0xad   : > { %813 = vmatprep.mubr.bf16.mxu0 %v438_v47 }
  0xaf   : > { %949 = vmatmul.mubr.bf16.gmra.mxu1 %v443_v15 }
  0xb0   : > { %956 = vmatprep.mubr.bf16.mxu1 %v446_v16 }
  0xb4   : > { %814 = vmatmul.mubr.bf16.gmra.mxu0 %v437_v56  ;;  %v1132_v56 = vsub.s32 0, %v1131_v33 }
  0xb5   : > { %823 = vmatprep.mubr.bf16.mxu0 %v440_v57  ;;  %v1136_v57 = vsub.s32 1, %v1131_v33 }
  0xb6   : > { %v2538_v63 = vrot.slane %v1128_v35, %v1132_v56 }
  0xb7   : > { %957 = vmatmul.mubr.bf16.gmra.mxu1 %v445_v21  ;;  %v2540_v0 = vrot.slane %v1128_v35, %v1136_v57 }
  0xb8   : > { %964 = vmatprep.mubr.bf16.mxu1 %v448_v22 }
  0xbc   : > { %824 = vmatmul.mubr.bf16.gmra.mxu0 %v439_v2 }
  0xbd   : > { %833 = vmatprep.mubr.bf16.mxu0 %v442_v3 }
  0xbf   : > { %965 = vmatmul.mubr.bf16.gmra.mxu1 %v447_v27 }
  0xc0   : > { %972 = vmatprep.mubr.bf16.mxu1 %v450_v28 }
  0xc4   : > { %834 = vmatmul.mubr.bf16.gmra.mxu0 %v441_v9 }
  0xc5   : > { %843 = vmatprep.mubr.bf16.mxu0 %v444_v10 }
  0xc7   : > { %973 = vmatmul.mubr.bf16.gmra.mxu1 %v449_v31 }
  0xcc   : > { %844 = vmatmul.mubr.bf16.gmra.mxu0 %v443_v15 }
  0xcd   : > { %853 = vmatprep.mubr.bf16.mxu0 %v446_v16 }
  0xd4   : > { %854 = vmatmul.mubr.bf16.gmra.mxu0 %v445_v21 }
  0xd5   : > { %863 = vmatprep.mubr.bf16.mxu0 %v448_v22 }
  0xdc   : > { %864 = vmatmul.mubr.bf16.gmra.mxu0 %v447_v27 }
  0xdd   : > { %873 = vmatprep.mubr.bf16.mxu0 %v450_v28 }
  0xe4   : > { %874 = vmatmul.mubr.bf16.gmra.mxu0 %v449_v31 }
 0x14f   : > { %v1690_v36 = vpop.f32.mrf.mxu1 }
 0x151   : > { %v1691_v38 = vpop.f32.mrf.mxu1 }
 0x152   : > { %v1692_v39 = vadd.f32 %v1691_v38, %v1690_v36 }
 0x153   : > { %v1693_v40 = vpop.f32.mrf.mxu1 }
 0x154   : > { %v1147_v41 = vadd.f32 %v1692_v39, %v2525_v37 }
 0x155   : > { %v1694_v42 = vpop.f32.mrf.mxu1 }
 0x156   : > { %v1643_v43 = vpack.c.bf16 %v1147_v41, %v1147_v41  ;;  %v1695_v44 = vadd.f32 %v1694_v42, %v1693_v40 }
 0x157   : > { %v1696_v45 = vpop.f32.mrf.mxu1 }
 0x158   : > { %1354 = vst [vmem:[%s2530_s15 + $0x8] sm:$0xf] %v1643_v43  ;;  %v1150_v46 = vadd.f32 %v1695_v44, %v2525_v37 }
 0x159   : > { %v1697_v47 = vpop.f32.mrf.mxu1 }
 0x15a   : > { %v1645_v48 = vpack.c.bf16 %v1150_v46, %v1150_v46  ;;  %v1698_v49 = vadd.f32 %v1697_v47, %v1696_v45 }
 0x15b   : > { %v1699_v50 = vpop.f32.mrf.mxu1 }
 0x15c   : > { %1356 = vst [vmem:[%s2530_s15 + $0x14] sm:$0xf] %v1645_v48  ;;  %v1153_v51 = vadd.f32 %v1698_v49, %v2525_v37 }
 0x15d   : > { %v1700_v52 = vpop.f32.mrf.mxu1 }
 0x15e   : > { %v1647_v53 = vpack.c.bf16 %v1153_v51, %v1153_v51  ;;  %v1701_v54 = vadd.f32 %v1700_v52, %v1699_v50 }
 0x15f   : > { %v1702_v55 = vpop.f32.mrf.mxu1 }
 0x160   : > { %1358 = vst [vmem:[%s2530_s15 + $0x20] sm:$0xf] %v1647_v53  ;;  %v1156_v58 = vadd.f32 %v1701_v54, %v2525_v37 }
 0x161   : > { %v1703_v59 = vpop.f32.mrf.mxu1 }
 0x162   : > { %v1649_v60 = vpack.c.bf16 %v1156_v58, %v1156_v58  ;;  %v1704_v61 = vadd.f32 %v1703_v59, %v1702_v55 }
 0x163   : > { %v1705_v62 = vpop.f32.mrf.mxu1 }
 0x164   : > { %1360 = vst [vmem:[%s2530_s15 + $0x2c] sm:$0xf] %v1649_v60  ;;  %v1159_v1 = vadd.f32 %v1704_v61, %v2525_v37 }
 0x165   : > { %v1706_v3 = vpop.f32.mrf.mxu1 }
 0x166   : > { %v1651_v4 = vpack.c.bf16 %v1159_v1, %v1159_v1  ;;  %v1707_v5 = vadd.f32 %v1706_v3, %v1705_v62 }
 0x167   : > { %v1708_v7 = vpop.f32.mrf.mxu1 }
 0x168   : > { %1362 = vst [vmem:[%s2530_s15 + $0x38] sm:$0xf] %v1651_v4  ;;  %v1162_v10 = vadd.f32 %v1707_v5, %v2525_v37 }
 0x169   : > { %v1709_v12 = vpop.f32.mrf.mxu1 }
 0x16a   : > { %v1653_v14 = vpack.c.bf16 %v1162_v10, %v1162_v10  ;;  %v1710_v15 = vadd.f32 %v1709_v12, %v1708_v7 }
 0x16b   : > { %v1711_v17 = vpop.f32.mrf.mxu1 }
 0x16c   : > { %v805_v2 = vpop.f32.mrf.mxu0  ;;  %1364 = vst [vmem:[%s2530_s15 + $0x44] sm:$0xf] %v1653_v14  ;;  %v1165_v20 = vadd.f32 %v1710_v15, %v2525_v37 }
 0x16d   : > { %v1145_v8 = vadd.f32 %v2538_v63, %v805_v2  ;;  %v1712_v22 = vpop.f32.mrf.mxu1 }
 0x16e   : > { %v807_v6 = vpop.f32.mrf.mxu0  ;;  %v1655_v24 = vpack.c.bf16 %v1165_v20, %v1165_v20  ;;  %v1713_v25 = vadd.f32 %v1712_v22, %v1711_v17 }
 0x16f   : > { %v1146_v9 = vadd.f32 %v2540_v0, %v807_v6  ;;  %v1714_v27 = vpop.f32.mrf.mxu1 }
 0x170   : > { %v809_v11 = vpop.f32.mrf.mxu0  ;;  %1366 = vst [vmem:[%s2530_s15 + $0x50] sm:$0xf] %v1655_v24  ;;  %v1168_v30 = vadd.f32 %v1713_v25, %v2525_v37 }
 0x171   : > { %v1642_v13 = vpack.c.bf16 %v1146_v9, %v1145_v8  ;;  %v1148_v18 = vadd.f32 %v2538_v63, %v809_v11  ;;  %v1715_v32 = vpop.f32.mrf.mxu1 }
 0x172   : > { %v811_v16 = vpop.f32.mrf.mxu0  ;;  %v1657_v34 = vpack.c.bf16 %v1168_v30, %v1168_v30  ;;  %v1716_v35 = vadd.f32 %v1715_v32, %v1714_v27 }
 0x173   : > { %1353 = vst [vmem:[%s2530_s15] sm:$0xff] %v1642_v13  ;;  %v1149_v19 = vadd.f32 %v2540_v0, %v811_v16  ;;  %v1717_v38 = vpop.f32.mrf.mxu1 }
 0x174   : > { %v815_v21 = vpop.f32.mrf.mxu0  ;;  %1368 = vst [vmem:[%s2530_s15 + $0x5c] sm:$0xf] %v1657_v34  ;;  %v1171_v41 = vadd.f32 %v1716_v35, %v2525_v37 }
 0x175   : > { %v1644_v23 = vpack.c.bf16 %v1149_v19, %v1148_v18  ;;  %v1151_v28 = vadd.f32 %v2538_v63, %v815_v21  ;;  %v1718_v43 = vpop.f32.mrf.mxu1 }
 0x176   : > { %v817_v26 = vpop.f32.mrf.mxu0  ;;  %v1659_v45 = vpack.c.bf16 %v1171_v41, %v1171_v41  ;;  %v1719_v46 = vadd.f32 %v1718_v43, %v1717_v38 }
 0x177   : > { %1355 = vst [vmem:[%s2530_s15 + $0xc] sm:$0xff] %v1644_v23  ;;  %v1152_v29 = vadd.f32 %v2540_v0, %v817_v26  ;;  %v1720_v48 = vpop.f32.mrf.mxu1 }
 0x178   : > { %v819_v31 = vpop.f32.mrf.mxu0  ;;  %1370 = vst [vmem:[%s2530_s15 + $0x68] sm:$0xf] %v1659_v45  ;;  %v1174_v51 = vadd.f32 %v1719_v46, %v2525_v37 }
 0x179   : > { %v1646_v33 = vpack.c.bf16 %v1152_v29, %v1151_v28  ;;  %v1154_v39 = vadd.f32 %v2538_v63, %v819_v31  ;;  %v1721_v53 = vpop.f32.mrf.mxu1 }
 0x17a   : > { %v821_v36 = vpop.f32.mrf.mxu0  ;;  %v1661_v55 = vpack.c.bf16 %v1174_v51, %v1174_v51  ;;  %v1722_v56 = vadd.f32 %v1721_v53, %v1720_v48 }
 0x17b   : > { %1357 = vst [vmem:[%s2530_s15 + $0x18] sm:$0xff] %v1646_v33  ;;  %v1155_v40 = vadd.f32 %v2540_v0, %v821_v36  ;;  %v1723_v58 = vpop.f32.mrf.mxu1 }
 0x17c   : > { %v825_v42 = vpop.f32.mrf.mxu0  ;;  %1372 = vst [vmem:[%s2530_s15 + $0x74] sm:$0xf] %v1661_v55  ;;  %v1177_v61 = vadd.f32 %v1722_v56, %v2525_v37 }
 0x17d   : > { %v1648_v44 = vpack.c.bf16 %v1155_v40, %v1154_v39  ;;  %v1157_v49 = vadd.f32 %v2538_v63, %v825_v42  ;;  %v1724_v1 = vpop.f32.mrf.mxu1 }
 0x17e   : > { %v827_v47 = vpop.f32.mrf.mxu0  ;;  %v1663_v3 = vpack.c.bf16 %v1177_v61, %v1177_v61  ;;  %v1725_v4 = vadd.f32 %v1724_v1, %v1723_v58 }
 0x17f   : > { %1359 = vst [vmem:[%s2530_s15 + $0x24] sm:$0xff] %v1648_v44  ;;  %v1158_v50 = vadd.f32 %v2540_v0, %v827_v47  ;;  %v1726_v6 = vpop.f32.mrf.mxu1 }
 0x180   : > { %v829_v52 = vpop.f32.mrf.mxu0  ;;  %1374 = vst [vmem:[%s2530_s15 + $0x80] sm:$0xf] %v1663_v3  ;;  %v1180_v9 = vadd.f32 %v1725_v4, %v2525_v37 }
 0x181   : > { %v1650_v54 = vpack.c.bf16 %v1158_v50, %v1157_v49  ;;  %v1160_v59 = vadd.f32 %v2538_v63, %v829_v52  ;;  %v1727_v11 = vpop.f32.mrf.mxu1 }
 0x182   : > { %v831_v57 = vpop.f32.mrf.mxu0  ;;  %v1665_v13 = vpack.c.bf16 %v1180_v9, %v1180_v9  ;;  %v1728_v14 = vadd.f32 %v1727_v11, %v1726_v6 }
 0x183   : > { %1361 = vst [vmem:[%s2530_s15 + $0x30] sm:$0xff] %v1650_v54  ;;  %v1161_v60 = vadd.f32 %v2540_v0, %v831_v57  ;;  %v1729_v16 = vpop.f32.mrf.mxu1 }
 0x184   : > { %v835_v62 = vpop.f32.mrf.mxu0  ;;  %1376 = vst [vmem:[%s2530_s15 + $0x8c] sm:$0xf] %v1665_v13  ;;  %v1183_v19 = vadd.f32 %v1728_v14, %v2525_v37 }
 0x185   : > { %v1652_v2 = vpack.c.bf16 %v1161_v60, %v1160_v59  ;;  %v1163_v7 = vadd.f32 %v2538_v63, %v835_v62  ;;  %v1730_v21 = vpop.f32.mrf.mxu1 }
 0x186   : > { %v837_v5 = vpop.f32.mrf.mxu0  ;;  %v1667_v23 = vpack.c.bf16 %v1183_v19, %v1183_v19  ;;  %v1731_v24 = vadd.f32 %v1730_v21, %v1729_v16 }
 0x187   : > { %1363 = vst [vmem:[%s2530_s15 + $0x3c] sm:$0xff] %v1652_v2  ;;  %v1164_v8 = vadd.f32 %v2540_v0, %v837_v5  ;;  %v1732_v26 = vpop.f32.mrf.mxu1 }
 0x188   : > { %v839_v10 = vpop.f32.mrf.mxu0  ;;  %1378 = vst [vmem:[%s2530_s15 + $0x98] sm:$0xf] %v1667_v23  ;;  %v1186_v29 = vadd.f32 %v1731_v24, %v2525_v37 }
 0x189   : > { %v1654_v12 = vpack.c.bf16 %v1164_v8, %v1163_v7  ;;  %v1166_v17 = vadd.f32 %v2538_v63, %v839_v10  ;;  %v1733_v31 = vpop.f32.mrf.mxu1 }
 0x18a   : > { %v841_v15 = vpop.f32.mrf.mxu0  ;;  %v1669_v33 = vpack.c.bf16 %v1186_v29, %v1186_v29  ;;  %v1734_v34 = vadd.f32 %v1733_v31, %v1732_v26 }
 0x18b   : > { %1365 = vst [vmem:[%s2530_s15 + $0x48] sm:$0xff] %v1654_v12  ;;  %v1167_v18 = vadd.f32 %v2540_v0, %v841_v15  ;;  %v1735_v36 = vpop.f32.mrf.mxu1 }
 0x18c   : > { %v845_v20 = vpop.f32.mrf.mxu0  ;;  %1380 = vst [vmem:[%s2530_s15 + $0xa4] sm:$0xf] %v1669_v33  ;;  %v1189_v40 = vadd.f32 %v1734_v34, %v2525_v37 }
 0x18d   : > { %v1656_v22 = vpack.c.bf16 %v1167_v18, %v1166_v17  ;;  %v1169_v27 = vadd.f32 %v2538_v63, %v845_v20  ;;  %v1736_v42 = vpop.f32.mrf.mxu1 }
 0x18e   : > { %v847_v25 = vpop.f32.mrf.mxu0  ;;  %v1671_v44 = vpack.c.bf16 %v1189_v40, %v1189_v40  ;;  %v1737_v45 = vadd.f32 %v1736_v42, %v1735_v36 }
 0x18f   : > { %1367 = vst [vmem:[%s2530_s15 + $0x54] sm:$0xff] %v1656_v22  ;;  %v1170_v28 = vadd.f32 %v2540_v0, %v847_v25 }
 0x190   : > { %v849_v30 = vpop.f32.mrf.mxu0  ;;  %1382 = vst [vmem:[%s2530_s15 + $0xb0] sm:$0xf] %v1671_v44  ;;  %v1192_v49 = vadd.f32 %v1737_v45, %v2525_v37 }
 0x191   : > { %v1658_v32 = vpack.c.bf16 %v1170_v28, %v1169_v27  ;;  %v1172_v38 = vadd.f32 %v2538_v63, %v849_v30 }
 0x192   : > { %v851_v35 = vpop.f32.mrf.mxu0  ;;  %v1673_v52 = vpack.c.bf16 %v1192_v49, %v1192_v49 }
 0x193   : > { %1369 = vst [vmem:[%s2530_s15 + $0x60] sm:$0xff] %v1658_v32  ;;  %v1173_v39 = vadd.f32 %v2540_v0, %v851_v35 }
 0x194   : > { %v855_v41 = vpop.f32.mrf.mxu0  ;;  %1384 = vst [vmem:[%s2530_s15 + $0xbc] sm:$0xf] %v1673_v52 }
 0x195   : > { %v1660_v43 = vpack.c.bf16 %v1173_v39, %v1172_v38  ;;  %v1175_v47 = vadd.f32 %v2538_v63, %v855_v41 }
 0x196   : > { %v857_v46 = vpop.f32.mrf.mxu0 }
 0x197   : > { %1371 = vst [vmem:[%s2530_s15 + $0x6c] sm:$0xff] %v1660_v43  ;;  %v1176_v48 = vadd.f32 %v2540_v0, %v857_v46 }
 0x198   : > { %v859_v50 = vpop.f32.mrf.mxu0 }
 0x199   : > { %v1662_v51 = vpack.c.bf16 %v1176_v48, %v1175_v47  ;;  %v1178_v54 = vadd.f32 %v2538_v63, %v859_v50 }
 0x19a   : > { %v861_v53 = vpop.f32.mrf.mxu0 }
 0x19b   : > { %1373 = vst [vmem:[%s2530_s15 + $0x78] sm:$0xff] %v1662_v51  ;;  %v1179_v55 = vadd.f32 %v2540_v0, %v861_v53 }
 0x19c   : > { %v865_v56 = vpop.f32.mrf.mxu0 }
 0x19d   : > { %v1664_v57 = vpack.c.bf16 %v1179_v55, %v1178_v54  ;;  %v1181_v37 = vadd.f32 %v2538_v63, %v865_v56 }
 0x19e   : > { %v867_v58 = vpop.f32.mrf.mxu0 }
 0x19f   : > { %1375 = vst [vmem:[%s2530_s15 + $0x84] sm:$0xff] %v1664_v57  ;;  %v1182_v59 = vadd.f32 %v2540_v0, %v867_v58 }
 0x1a0   : > { %v869_v60 = vpop.f32.mrf.mxu0 }
 0x1a1   : > { %v1666_v61 = vpack.c.bf16 %v1182_v59, %v1181_v37  ;;  %v1184_v1 = vadd.f32 %v2538_v63, %v869_v60 }
 0x1a2   : > { %v871_v62 = vpop.f32.mrf.mxu0 }
 0x1a3   : > { %1377 = vst [vmem:[%s2530_s15 + $0x90] sm:$0xff] %v1666_v61  ;;  %v1185_v2 = vadd.f32 %v2540_v0, %v871_v62 }
 0x1a4   : > { %v875_v3 = vpop.f32.mrf.mxu0 }
 0x1a5   : > { %v1668_v4 = vpack.c.bf16 %v1185_v2, %v1184_v1  ;;  %v1187_v6 = vadd.f32 %v2538_v63, %v875_v3 }
 0x1a6   : > { %v877_v5 = vpop.f32.mrf.mxu0 }
 0x1a7   : > { %1379 = vst [vmem:[%s2530_s15 + $0x9c] sm:$0xff] %v1668_v4  ;;  %v1188_v7 = vadd.f32 %v2540_v0, %v877_v5 }
 0x1a8   : > { %v879_v8 = vpop.f32.mrf.mxu0 }
 0x1a9   : > { %v1670_v9 = vpack.c.bf16 %v1188_v7, %v1187_v6  ;;  %v1190_v11 = vadd.f32 %v2538_v63, %v879_v8 }
 0x1aa   : > { %v881_v10 = vpop.f32.mrf.mxu0 }
 0x1ab   : > { %1381 = vst [vmem:[%s2530_s15 + $0xa8] sm:$0xff] %v1670_v9  ;;  %v1191_v12 = vadd.f32 %v2540_v0, %v881_v10 }
 0x1ad   : > { %v1672_v13 = vpack.c.bf16 %v1191_v12, %v1190_v11 }
 0x1af   : > { %1383 = vst [vmem:[%s2530_s15 + $0xb4] sm:$0xff] %v1672_v13 }
 0x1b0   : > { %2049 = shalt.err (!%p2046_p9)
}
 0x1b1   : > { %s2050_s5 = scalar_lea.hbm %s2620_s12, 3072  ;;  %s2054_s29 = scalar_lea.hbm %s2748_s3, 18432 }
 0x1b2   : > { %p2051_p10 = scmp.ne.s32.totalorder %s2620_s12, %s2050_s5  ;;  %p2055_p12 = scmp.lt.s32.totalorder %s2620_s12, %s2748_s3 }
 0x1b3   : > { %p2056_p0 = scmp.lt.s32.totalorder %s2054_s29, %s2050_s5 }
 0x1b4   : > { %p2052_p11 = pnand %p2051_p10, %p2384_p2 }
 0x1b5   : > { %p2057_p4 = por %p2056_p0, %p2055_p12 }
 0x1b6   : > { %p2053_p3 = pneg %p2052_p11 }
 0x1b8   : > { %p2058_p5 = pnand %p2057_p4, %p2053_p3 }
 0x1ba   : > { %2061 = shalt.err (!%p2058_p5)
}
 0x1bb   : > { %s2195_s15 = smov 192   ;;  %s2196_s22 = smov 384  }
 0x1bc   : > { %s2197_s27 = smov 12  }
 0x1bd   : > { %1750 = dma.vmem_to_hbm [thread:$0]  (%p2384_p2), %s2622_s18, 3072, %s2620_s12, %s2627_s14, %s2195_s15, %s2196_s22, %s2197_s27  }
 0x1be PF: > { %s2749_s7 = sld [smem:[#allocation13_spill]]  ;;  %p1767_p7 = scmp.ge.s32.totalorder %s2184_s25, 2 }
 0x1bf   : > { %p2750_p1 = scmp.ne.s32.totalorder %s2741_s6, 0 }
 0x1c1   : > { %p1763_p8 = pnand %p1767_p7, %p2750_p1 }
 0x1c3   : > { %p1764_p13 = pneg %p1763_p8 }
 0x1c4   : > { %s1417_s10 = sand.u32 1, %s2749_s7  }
 0x1c5   : > { %s1418_s4 = scalar_lea.sflag [#allocation5], %s1417_s10 }
 0x1c6   : > { %2127 = dma.done.wait (%p1764_p13), %s1418_s4, 3072  }
 0x1c7   : > { %2129 = vsyncadd (%p1764_p13), %s1418_s4, 4294964224  ;;  %s22_s25 = sadd.s32 1, %s2184_s25   ;;  %s2752_s9 = sld [smem:[#allocation14_spill]] }
 0x1c8   : > { %p2655_p6 = scmp.ge.s32.totalorder %s22_s25, 8   ;;  %s2753_s14 = sld [smem:[#allocation24_spill]] }
 0x1c9   : > { %s2754_s18 = sld [smem:[#allocation22_spill]]  ;;  %s2761_s12 = smov %s2136_s13 }
 0x1ca   : > { %s2755_s21 = sld [smem:[#allocation15_spill]]  ;;  %s2763_s15 = smov %s2148_s16 }
 0x1cb   : > { %s2756_s20 = sld [smem:[#allocation23_spill]]  ;;  %s2764_s16 = smov %s2152_s17 }
 0x1cc   : > { %s2757_s6 = sld [smem:[#allocation18_spill]] }
 0x1cd   : > { %s2758_s22 = sld [smem:[#allocation19_spill]]  ;;  %s2762_s13 = smov %s2752_s9 }
 0x1ce   : > { %s2759_s23 = sld [smem:[#allocation20_spill]]  ;;  %21 = sbr.rel (!%p2655_p6) target bundleno = 16 (0x10), region = 109 }
 0x1cf   : > { %s2760_s24 = sld [smem:[#allocation21_spill]]  ;;  %s2765_s17 = smov %s2754_s18 }
 0x1d0   : > { %s2766_s18 = smov %s2160_s19  ;;  %s2767_s19 = smov %s2755_s21 }
 0x1d2   : > { %s2768_s21 = smov %s2757_s6 }
 0x1d3   :  { %1423 = vsyncpa [#allocation4], 1 }
 0x1d4   :  { %1425 = vsyncpa [#allocation4 + $0x1], 1 }
 0x1d5   :  { %1426 = vsyncpa [#allocation7], 1 }
 0x1d6   :  { %1428 = vsyncpa [#allocation7 + $0x1], 1 }
 0x1d7   :  { %1429 = vsyncpa [#allocation5], 1 }
 0x1d8   :  { %1431 = vsyncpa [#allocation5 + $0x1], 1 }

</bundles_post_ra>
